<compile_context>
chip_gen: v5e
topology: v5e:2x2
jax: 0.10.0
libtpu: 0.0.40
codegen_flags: <defaults>
</compile_context>

<pallas_src>
import functools
import math

import jax
import jax.numpy as jnp
from jax.experimental import pallas as pl
from jax.experimental.pallas import tpu as pltpu


def _mca_kernel(x1_ref, x2_ref, o_ref, *, mxu_dtype):
    # Block = (TB, S, D): TB batch elements per grid step.
    x1 = x1_ref[...]                                 # (TB, S, D), input dtype
    x2 = x2_ref[...]                                 # (TB, S, D)
    x1m = x1.astype(mxu_dtype)                       # no-op unless mxu_bf16 on f32 inputs
    x2m = x2.astype(mxu_dtype)

    d = x1.shape[-1]
    scale = 1.0 / math.sqrt(d)

    # One QK^T shared by both directions (direction-B scores are scores^T).  The last
    # dims are contracted natively (no operand transpose); 1/sqrt(D) is applied to the
    # f32 scores so the raw inputs double as values (single live copy of each input).
    scores = jnp.einsum("bqd,bkd->bqk", x1m, x2m,
                        preferred_element_type=jnp.float32) * scale   # (TB,S,S) f32

    # --- shared exponentials --------------------------------------------------------
    # Row softmax (direction A) uses e = exp(scores - m_row).  The column softmax
    # (direction B) is invariant to any per-column shift, so it can reuse e via
    # ew = e * exp(m_row - m_glob) == exp(scores - m_glob): only O(S) extra exps
    # instead of a second full S^2 exp pass on the single EUP.
    # TODO(synk): per-column-max fallback if the per-batch score dynamic range can
    #             exceed ~80 (f32 exp underflow); irrelevant for normalised inputs.
    m_row = jnp.max(scores, axis=-1, keepdims=True)          # (TB,S,1)
    e = jnp.exp(scores - m_row)                              # (TB,S,S) f32
    row_sum = jnp.sum(e, axis=-1, keepdims=True)             # (TB,S,1)

    m_glob = jnp.max(m_row, axis=-2, keepdims=True)          # (TB,1,1)
    ew = e * jnp.exp(m_row - m_glob)                         # (TB,S,S) == exp(scores - m_glob)
    col_sum = jnp.sum(ew, axis=-2, keepdims=True)            # (TB,1,S)

    # --- direction A: query = x1, key/value = x2 -------------------------------------
    # Normalise AFTER the matmul: exact f32 divide of a (TB,S,D) tensor instead of a
    # (TB,S,S) one, and no separate attention-weight buffer.
    out_a = jnp.einsum("bqk,bkd->bqd", e.astype(mxu_dtype), x2m,
                       preferred_element_type=jnp.float32) * (1.0 / row_sum)

    # --- direction B: query = x2, key/value = x1 -------------------------------------
    # Column softmax of `scores` and a contraction over the leading (q) dim; no
    # explicit f32 transpose of the score matrix is materialised.
    attn_bT = (ew * (1.0 / col_sum)).astype(mxu_dtype)        # (TB,S,S)
    out_b = jnp.einsum("bqk,bqd->bkd", attn_bT, x1m,
                       preferred_element_type=jnp.float32)    # (TB,S,D) f32

    # TODO(synk): training-mode dropout would mask the attention weights here via
    #             pltpu.prng_random_bits; identity == eval mode / p = 0.
    o_ref[...] = (out_a + out_b).astype(o_ref.dtype)


def _vmem_capacity_bytes():
    # Generation-aware VMEM: 128 MiB on v5e/v6e, 64 MiB per TensorCore on v7x.
    try:
        cap = int(getattr(pltpu.get_tpu_info(), "vmem_capacity_bytes", 0))
        if cap > 0:
            return cap
    except Exception:
        pass
    return 64 * 1024 * 1024            # conservative fallback (v7x per-core VMEM)


def _choose_batch_tile(B, S, D, itemsize, budget_bytes):
    """Largest batch tile TB (a divisor of B) whose per-step working set fits the VMEM
    budget.  Among fitting tiles, prefer one giving an EVEN number of grid steps so the
    two v7x TensorCores split the parallel batch axis evenly; on single-TC parts the
    extra grid step is only ~0.35 us of overhead."""

    def step_bytes(tb):
        io = 2 * 3 * tb * S * D * itemsize        # x1/x2/out tiles, double-buffered
        expo = 2 * tb * S * S * 4                 # e and ew (shared exps), f32
        if itemsize < 4:
            expo += tb * S * S * itemsize         # low-precision weight cast for the MXU
        accum = 2 * tb * S * D * 4                # out_a / out_b f32 accumulators
        return io + expo + accum

    fitting = [tb for tb in range(1, B + 1)
               if B % tb == 0 and step_bytes(tb) <= budget_bytes]
    if not fitting:
        # TODO(synk): query-tiled / online-softmax (flash-style) path for large S where
        #             even a single batch element's S^2 f32 working set exceeds VMEM.
        raise ValueError(
            f"MutualCrossAttention Pallas kernel: S={S} is too large for the VMEM "
            f"budget ({budget_bytes} bytes); a flash-style tiling is required.")
    even = [tb for tb in fitting if (B // tb) % 2 == 0]
    return max(even) if even else max(fitting)


@functools.partial(jax.jit, static_argnames=("mxu_bf16",))
def mutual_cross_attention(x1, x2, *, mxu_bf16=False):
    """Pallas implementation of MutualCrossAttention.forward (dropout == identity).

    mxu_bf16=True casts MXU operands of f32 inputs to bf16 (large MXU-throughput win,
    especially on v5e) while keeping softmax math and accumulation in f32.
    """
    assert x1.shape == x2.shape and x1.ndim == 3
    B, S, D = x1.shape

    vmem_cap = _vmem_capacity_bytes()
    vmem_limit = min(int(vmem_cap * 0.80), 112 * 1024 * 1024)
    tile_budget = max(vmem_limit - 8 * 1024 * 1024, vmem_limit // 2)

    tb = _choose_batch_tile(B, S, D, x1.dtype.itemsize, tile_budget)
    grid = (B // tb,)

    mxu_dtype = jnp.bfloat16 if (mxu_bf16 and x1.dtype == jnp.float32) else x1.dtype
    kernel = functools.partial(_mca_kernel, mxu_dtype=mxu_dtype)

    # TODO(synk): for D < 128 a lane-dense (B, S*D) output slab would avoid masked
    #             vst.msk partial stores; skipped to keep the kernel relayout-free.
    return pl.pallas_call(
        kernel,
        out_shape=jax.ShapeDtypeStruct((B, S, D), x1.dtype),
        grid_spec=pltpu.PrefetchScalarGridSpec(
            num_scalar_prefetch=0,
            grid=grid,
            in_specs=[
                pl.BlockSpec((tb, S, D), lambda b: (b, 0, 0)),
                pl.BlockSpec((tb, S, D), lambda b: (b, 0, 0)),
            ],
            out_specs=pl.BlockSpec((tb, S, D), lambda b: (b, 0, 0)),
        ),
        compiler_params=pltpu.CompilerParams(
            dimension_semantics=("parallel",),
            vmem_limit_bytes=vmem_limit,
        ),
    )(x1, x2)


def _reference(x1, x2):
    d = x1.shape[-1]
    s_a = jnp.einsum("bqd,bkd->bqk", x1, x2, precision="highest") / math.sqrt(d)
    out_a = jnp.einsum("bqk,bkd->bqd", jax.nn.softmax(s_a, axis=-1), x2,
                       precision="highest")
    s_b = jnp.einsum("bqd,bkd->bqk", x2, x1, precision="highest") / math.sqrt(d)
    out_b = jnp.einsum("bqk,bkd->bqd", jax.nn.softmax(s_b, axis=-1), x1,
                       precision="highest")
    return out_a + out_b


if __name__ == "__main__":
    key = jax.random.PRNGKey(0)
    k1, k2 = jax.random.split(key)

    B, S, D = 2, 8, 32
    x1 = jax.random.normal(k1, (B, S, D), dtype=jnp.float32)
    x2 = jax.random.normal(k2, (B, S, D), dtype=jnp.float32)

    out = mutual_cross_attention(x1, x2)
    jax.block_until_ready(out)

    ref = _reference(x1, x2)
    assert out.shape == (B, S, D)
    assert jnp.allclose(out, ref, atol=2e-3, rtol=2e-3), "mismatch vs reference"

    print("KERNEL_OK")
</pallas_src>

<mosaic_0001>
module attributes {stable_mosaic.version = 11 : i64} {
  func.func @_mca_kernel(%arg0: i32, %arg1: memref<1x8x32xf32, #tpu.memory_space<vmem>>, %arg2: memref<1x8x32xf32, #tpu.memory_space<vmem>>, %arg3: memref<1x8x32xf32, #tpu.memory_space<vmem>>) attributes {dimension_semantics = [#tpu.dimension_semantics<parallel>], iteration_bounds = array<i64: 2>, scalar_prefetch = 0 : i64, scratch_operands = 0 : i64, tpu.core_type = #tpu.core_type<tc>, window_params = [{transform_indices = @transform_0, window_bounds = array<i64: 1, 8, 32>}, {transform_indices = @transform_1, window_bounds = array<i64: 1, 8, 32>}, {transform_indices = @transform_2, window_bounds = array<i64: 1, 8, 32>}]} {
    %c0 = arith.constant 0 : index
    %c0_0 = arith.constant 0 : index
    %c0_1 = arith.constant 0 : index
    %0 = vector.load %arg1[%c0, %c0_0, %c0_1] : memref<1x8x32xf32, #tpu.memory_space<vmem>>, vector<1x8x32xf32>
    %c0_2 = arith.constant 0 : index
    %c0_3 = arith.constant 0 : index
    %c0_4 = arith.constant 0 : index
    %1 = vector.load %arg2[%c0_2, %c0_3, %c0_4] : memref<1x8x32xf32, #tpu.memory_space<vmem>>, vector<1x8x32xf32>
    "tpu.trace_start"() <{level = 10 : i32, message = "bqd,bkd->bqk"}> : () -> ()
    %cst = arith.constant dense<0.000000e+00> : vector<1x8x8xf32>
    %2 = tpu.matmul %0, %1, %cst {dimension_numbers = #tpu.dot_dimension_numbers<[2], [2], [1], [1], [0, 0, 0, 1, 1, 1], [0], [0]>} : vector<1x8x32xf32>, vector<1x8x32xf32>, vector<1x8x8xf32> -> vector<1x8x8xf32>
    "tpu.trace_stop"() : () -> ()
    %cst_5 = arith.constant 0.176776692 : f32
    %3 = vector.broadcast %cst_5 : f32 to vector<1x8x8xf32>
    %4 = arith.mulf %2, %3 : vector<1x8x8xf32>
    %cst_6 = arith.constant dense<0xFF800000> : vector<1x8xf32>
    %5 = vector.multi_reduction <maximumf>, %4, %cst_6 [2] : vector<1x8x8xf32> to vector<1x8xf32>
    %6 = vector.shape_cast %5 : vector<1x8xf32> to vector<1x8x1xf32>
    %7 = vector.broadcast %6 : vector<1x8x1xf32> to vector<1x8x8xf32>
    %8 = arith.subf %4, %7 : vector<1x8x8xf32>
    %9 = math.exp %8 : vector<1x8x8xf32>
    %cst_7 = arith.constant dense<0.000000e+00> : vector<1x8xf32>
    %10 = vector.multi_reduction <add>, %9, %cst_7 [2] : vector<1x8x8xf32> to vector<1x8xf32>
    %11 = vector.shape_cast %10 : vector<1x8xf32> to vector<1x8x1xf32>
    %cst_8 = arith.constant dense<0xFF800000> : vector<1x1xf32>
    %12 = vector.multi_reduction <maximumf>, %6, %cst_8 [1] : vector<1x8x1xf32> to vector<1x1xf32>
    %13 = vector.shape_cast %12 : vector<1x1xf32> to vector<1x1x1xf32>
    %14 = vector.broadcast %13 : vector<1x1x1xf32> to vector<1x8x1xf32>
    %15 = arith.subf %6, %14 : vector<1x8x1xf32>
    %16 = math.exp %15 : vector<1x8x1xf32>
    %17 = vector.broadcast %16 : vector<1x8x1xf32> to vector<1x8x8xf32>
    %18 = arith.mulf %9, %17 : vector<1x8x8xf32>
    %cst_9 = arith.constant dense<0.000000e+00> : vector<1x8xf32>
    %19 = vector.multi_reduction <add>, %18, %cst_9 [1] : vector<1x8x8xf32> to vector<1x8xf32>
    %20 = vector.shape_cast %19 : vector<1x8xf32> to vector<1x1x8xf32>
    "tpu.trace_start"() <{level = 10 : i32, message = "bqk,bkd->bqd"}> : () -> ()
    %cst_10 = arith.constant dense<0.000000e+00> : vector<1x8x32xf32>
    %21 = tpu.matmul %9, %1, %cst_10 {dimension_numbers = #tpu.dot_dimension_numbers<[2], [1], [1], [2], [0, 0, 0, 1, 1, 2], [0], [0]>} : vector<1x8x8xf32>, vector<1x8x32xf32>, vector<1x8x32xf32> -> vector<1x8x32xf32>
    "tpu.trace_stop"() : () -> ()
    %cst_11 = arith.constant 1.000000e+00 : f32
    %22 = vector.broadcast %cst_11 : f32 to vector<1x8x1xf32>
    %23 = arith.divf %22, %11 : vector<1x8x1xf32>
    %24 = vector.broadcast %23 : vector<1x8x1xf32> to vector<1x8x32xf32>
    %25 = arith.mulf %21, %24 : vector<1x8x32xf32>
    %cst_12 = arith.constant 1.000000e+00 : f32
    %26 = vector.broadcast %cst_12 : f32 to vector<1x1x8xf32>
    %27 = arith.divf %26, %20 : vector<1x1x8xf32>
    %28 = vector.broadcast %27 : vector<1x1x8xf32> to vector<1x8x8xf32>
    %29 = arith.mulf %18, %28 : vector<1x8x8xf32>
    "tpu.trace_start"() <{level = 10 : i32, message = "bqk,bqd->bkd"}> : () -> ()
    %cst_13 = arith.constant dense<0.000000e+00> : vector<1x8x32xf32>
    %30 = tpu.matmul %29, %0, %cst_13 {dimension_numbers = #tpu.dot_dimension_numbers<[1], [1], [2], [2], [0, 0, 0, 2, 1, 2], [0], [0]>} : vector<1x8x8xf32>, vector<1x8x32xf32>, vector<1x8x32xf32> -> vector<1x8x32xf32>
    "tpu.trace_stop"() : () -> ()
    %31 = arith.addf %25, %30 : vector<1x8x32xf32>
    %c0_14 = arith.constant 0 : index
    %c0_15 = arith.constant 0 : index
    %c0_16 = arith.constant 0 : index
    %32 = vector.load %arg3[%c0_14, %c0_15, %c0_16] : memref<1x8x32xf32, #tpu.memory_space<vmem>>, vector<1x8x32xf32>
    tpu.vector_store %arg3[%c0_14, %c0_15, %c0_16], %31 {strides = array<i32>} : memref<1x8x32xf32, #tpu.memory_space<vmem>>, vector<1x8x32xf32>,
    return
  }
  func.func @transform_0(%arg0: i32) -> (i32, i32, i32) {
    %c0_i32 = arith.constant 0 : i32
    %c0_i32_0 = arith.constant 0 : i32
    %c0_i32_1 = arith.constant 0 : i32
    return %arg0, %c0_i32, %c0_i32_0 : i32, i32, i32
  }
  func.func @transform_1(%arg0: i32) -> (i32, i32, i32) {
    %c0_i32 = arith.constant 0 : i32
    %c0_i32_0 = arith.constant 0 : i32
    %c0_i32_1 = arith.constant 0 : i32
    return %arg0, %c0_i32, %c0_i32_0 : i32, i32, i32
  }
  func.func @transform_2(%arg0: i32) -> (i32, i32, i32) {
    %c0_i32 = arith.constant 0 : i32
    %c0_i32_0 = arith.constant 0 : i32
    %c0_i32_1 = arith.constant 0 : i32
    return %arg0, %c0_i32, %c0_i32_0 : i32, i32, i32
  }
}

</mosaic_0001>

<bundles_post_ra>
// kernel: mutual_cross_attention.1
= control target key start
LH: loop header
LB: loop body
LE: loop exit
PB: predicated region body
PF: predicated region fallthrough
CT: control target
= control target key end

     0   :  { %7 = vsyncpa [#allocation3], 0  ;;  %s877_s0 = inlined_call_operand.hbm [shape: f32[2,8,32], index: 0, kind: input, shape index: {}]   ;;  %s878_s1 = inlined_call_operand.hbm [shape: f32[2,8,32], index: 1, kind: input, shape index: {}]   ;;  %s879_s2 = inlined_call_operand.hbm [shape: f32[2,8,32], index: 2, kind: output, shape index: {}]  }
   0x1   :  { %9 = vsyncpa [#allocation3 + $0x1], 0 }
   0x2   :  { %10 = vsyncpa [#allocation6], 0 }
   0x3   :  { %12 = vsyncpa [#allocation6 + $0x1], 0 }
   0x4   :  { %13 = vsyncpa [#allocation4], 0 }
   0x5   :  { %15 = vsyncpa [#allocation4 + $0x1], 0  ;;  %s704_s9 = smov 0   ;;  %s706_s10 = smov 0  }
   0x6   :  { %s708_s11 = smov 0   ;;  %s710_s12 = smov 0  }
   0x7 LB: > { %s725_s13 = sadd.s32 4294967295, %s687_s12   ;;  %s478_s14 = sadd.s32 4294967294, %s687_s12   ;;  %s687_s12 = sphi %s710_s12, %s890_s12   ;;  %s683_s11 = sphi %s708_s11, %s889_s11   ;;  %s679_s10 = sphi %s706_s10, %s888_s10   ;;  %s675_s9 = sphi %s704_s9, %s887_s9  }
   0x8   : > { %s729_s15 = sadd.s32 1, %s687_s12   ;;  %s28_s16 = sadd.s32 1, %s683_s11 }
   0x9   : > { %s25_s17 = ssub.s32 %s687_s12, %s729_s15  ;;  %p35_p0 = scmp.ne.s32.totalorder %s683_s11, %s679_s10 }
   0xa   : > { %p26_p1 = scmp.eq.s32.totalorder %s25_s17, 0  ;;  %p36_p2 = scmp.eq.s32.totalorder %s687_s12, 0 }
   0xb   : > { %p41_p3 = scmp.ne.s32.totalorder %s679_s10, %s675_s9  ;;  %p42_p4 = scmp.eq.s32.totalorder %s725_s13, 0 }
   0xc   : > { %s741_s18 = scalar_select %p26_p1, %s683_s11, %s28_s16  }
   0xd   : > { %p743_p5 = por %p36_p2, %p35_p0  ;;  %p747_p6 = por %p42_p4, %p41_p3 }
   0xe   : > { %p91_p7 = scmp.eq.s32.totalorder %s725_s13, 1  ;;  %p97_p8 = scmp.eq.s32.totalorder %s478_s14, 1 }
   0xf   : > { %p514_p10 = scmp.lt.s32.totalorder %s687_s12, 2  ;;  %s763_s23 = sand.u32 1, %s683_s11  }
  0x10   : > { %p754_p11 = por %p91_p7, %p35_p0  ;;  %p758_p12 = por %p97_p8, %p41_p3 }
  0x11   : > { %s482_s24 = sshll.u32 %s687_s12, 3  ;;  %s481_s25 = sshll.u32 %s763_s23, 3 }
  0x12   : > { %s125_s28 = scalar_lea.hbm %s877_s0, %s482_s24  ;;  %s121_s30 = scalar_lea.vmem [#allocation2], %s481_s25 }
  0x13   : > { %s127_s29 = sshll.u32 %s125_s28, 4  ;;  %s129_s3 = sshll.u32 %s121_s30, 4  ;;  %s128_s29 = int_to_ptr.hbm [resolvable:$true] %s127_s29  ;;  %s130_s3 = int_to_ptr.vmem [resolvable:$true] %s129_s3 }
  0x14   : > { %p772_p13 = pnand %p514_p10, %p743_p5  ;;  %p485_p0 = scmp.ge.s32.totalorder %s687_s12, 1 }
  0x15   : > { %p153_p1 = scmp.lt.s32.totalorder %s687_s12, 3  ;;  %s118_s5 = scalar_lea.sflag [#allocation3], %s763_s23 }
  0x16   : > { %s557_s6 = sshra.s32 %s128_s29, 4  ;;  %p561_p3 = pneg %p772_p13  ;;  %s558_s6 = int_to_ptr.hbm [resolvable:$true] %s557_s6 }
  0x17   : > { %s559_s7 = scalar_lea.hbm %s558_s6, 8  ;;  %s564_s16 = scalar_lea.hbm %s877_s0, 16 }
  0x18   : > { %p560_p2 = scmp.ne.s32.totalorder %s558_s6, %s559_s7  ;;  %p565_p5 = scmp.lt.s32.totalorder %s558_s6, %s877_s0 }
  0x19   : > { %p566_p8 = scmp.lt.s32.totalorder %s564_s16, %s559_s7 }
  0x1a   : > { %p562_p4 = pnand %p561_p3, %p560_p2 }
  0x1b   : > { %p567_p10 = por %p566_p8, %p565_p5 }
  0x1c   : > { %p563_p7 = pneg %p562_p4 }
  0x1e   : > { %p568_p9 = pnand %p567_p10, %p563_p7 }
  0x20   : > { %571 = shalt.err (!%p568_p9)
}
  0x21   : > { %506 = dma.hbm_to_vmem [thread:$0]  (!%p772_p13), %s128_s29, 128, %s130_s3, %s118_s5  }
  0x22   : > { %p796_p2 = pnand %p485_p0, %p153_p1  ;;  %s144_s30 = scalar_lea.hbm %s878_s1, %s482_s24 }
  0x23   : > { %s146_s6 = sshll.u32 %s144_s30, 4  ;;  %s140_s7 = scalar_lea.vmem [#allocation5], %s481_s25  ;;  %s147_s6 = int_to_ptr.hbm [resolvable:$true] %s146_s6 }
  0x24   : > { %s148_s8 = sshll.u32 %s140_s7, 4  ;;  %s137_s14 = scalar_lea.sflag [#allocation6], %s763_s23  ;;  %s149_s8 = int_to_ptr.vmem [resolvable:$true] %s148_s8 }
  0x25   : > { %s587_s16 = sshra.s32 %s147_s6, 4  ;;  %s594_s5 = scalar_lea.hbm %s878_s1, 16  ;;  %s588_s16 = int_to_ptr.hbm [resolvable:$true] %s587_s16 }
  0x26   : > { %s589_s17 = scalar_lea.hbm %s588_s16, 8  ;;  %p595_p4 = scmp.lt.s32.totalorder %s588_s16, %s878_s1 }
  0x27   : > { %p590_p9 = scmp.ne.s32.totalorder %s588_s16, %s589_s17  ;;  %p596_p7 = scmp.lt.s32.totalorder %s594_s5, %s589_s17 }
  0x29   : > { %p592_p0 = pnand %p590_p9, %p561_p3  ;;  %p597_p5 = por %p596_p7, %p595_p4 }
  0x2b   : > { %p593_p1 = pneg %p592_p0 }
  0x2d   : > { %p598_p8 = pnand %p597_p5, %p593_p1 }
  0x2f   : > { %601 = shalt.err (!%p598_p8)
}
  0x30   : > { %509 = dma.hbm_to_vmem [thread:$0]  (!%p772_p13), %s147_s6, 128, %s149_s8, %s137_s14  }
  0x31   : > { %157 = sbr.rel (%p796_p2) target bundleno = 665 (0x299), region = 28  ;;  %s818_s23 = sand.u32 (!%p796_p2), 1, %s679_s10  }
  0x32   : > { %s821_s25 = sshll.u32 (!%p796_p2), %s818_s23, 3  ;;  %s160_s27 = scalar_lea.sflag (!%p796_p2), [#allocation3], %s818_s23 }
  0x33   : > { %s163_s28 = scalar_lea.vmem (!%p796_p2), [#allocation2], %s821_s25 }
  0x36   : > { %662 = dma.done.wait (%p747_p6), %s160_s27, 128  }
  0x37   : > { %664 = vsyncadd (%p747_p6), %s160_s27, 4294967168  ;;  %s170_s4 = scalar_lea.sflag [#allocation6], %s818_s23  ;;  %s173_s26 = scalar_lea.vmem [#allocation5], %s821_s25 }
  0x38   : > { %666 = dma.done.wait (%p747_p6), %s170_s4, 128  }
  0x39   : > { %668 = vsyncadd (%p747_p6), %s170_s4, 4294967168  ;;  %vm202_vm0 = vcmask 261120   ;;  %v201_v0 = vld [vmem:[%s173_s26] sm:$0xff]  ;;  %v200_v1 = vld [vmem:[%s163_s28] sm:$0xff]  ;;  %vm230_vm1 = vcmask 64512   ;;  %s494_s20 = sshll.u32 %s725_s13, 3 }
  0x3a   : > { %489 = vmatpush.xpose.msk.msra.mxu0 %vm202_vm0, %v201_v0  ;;  %275 = vmatpush.msra.mxu1 %v201_v0  ;;  %s380_s7 = scalar_lea.hbm %s879_s2, %s494_s20  ;;  %s199_s8 = scalar_lea.vmem [#allocation7], %s821_s25 }
  0x3b   : > { %362 = vmatpush.msra.mxu2 %v200_v1  ;;  %s382_s14 = sshll.u32 %s199_s8, 4  ;;  %s384_s16 = sshll.u32 %s380_s7, 4  ;;  %s383_s14 = int_to_ptr.vmem [resolvable:$true] %s382_s14  ;;  %s385_s16 = int_to_ptr.hbm [resolvable:$true] %s384_s16 }
  0x3c   : > { %s370_s13 = scalar_lea.sflag [#allocation4], %s818_s23  ;;  %s631_s17 = sshra.s32 %s385_s16, 4  ;;  %s632_s17 = int_to_ptr.hbm [resolvable:$true] %s631_s17 }
  0x3d   : > { %490 = vmatmul.msk.f32.vlgmr.msra.gmra.mxu0 %vm202_vm0, %v200_v1  ;;  %s633_s29 = scalar_lea.hbm %s632_s17, 8  ;;  %s637_s19 = scalar_lea.hbm %s879_s2, 16 }
  0x3e   : > { %p634_p6 = scmp.ne.s32.totalorder %s632_s17, %s633_s29  ;;  %p638_p10 = scmp.lt.s32.totalorder %s632_s17, %s879_s2 }
  0x3f   : > { %p639_p2 = scmp.lt.s32.totalorder %s637_s19, %s633_s29 }
  0x40   : > { %p635_p13 = pnand %p634_p6, %p754_p11 }
  0x41   : > { %p640_p9 = por %p639_p2, %p638_p10 }
  0x42   : > { %p636_p3 = pneg %p635_p13 }
  0x44   : > { %p641_p0 = pnand %p640_p9, %p636_p3 }
  0xba   : > { %v226_v2 = vpop.f32.mrf.mxu0 }
  0xbb   : > { %v229_v3 = vmul.f32 0.17677669, %v226_v2 }
  0xbd   : > { %v231_v4 = vsel %vm230_vm1, %v229_v3, -inf }
  0xbe   : > { %232 = vmax.xlane.f32.xlu0 %v231_v4 }
 0x131   : > { %v233_v5 = vpop.xlane.xlu0 %232 }
 0x132   : > { %v234_v6 = vsub.f32 %v229_v3, %v233_v5  ;;  %v240_v7 = vrot.slane %v233_v5, 4 }
 0x134   : > { %v235_v8 = vmul.f32 1.442695, %v234_v6  ;;  %v241_v9 = vmax.f32 %v233_v5, %v240_v7 }
 0x136   : > { %549 = vpow2.f32 %v235_v8  ;;  %v242_v10 = vrot.slane %v241_v9, 2 }
 0x138   : > { %v243_v11 = vmax.f32 %v241_v9, %v242_v10 }
 0x13a   : > { %v244_v12 = vrot.slane %v243_v11, 1 }
 0x13c   : > { %v550_v13 = vpop.eup %549  ;;  %v245_v14 = vmax.f32 %v243_v11, %v244_v12 }
 0x13d   : > { %491 = vmatmul.msk.f32.vlgmr.msra.gmra.mxu1 %vm230_vm1, %v550_v13  ;;  %v237_v15 = vsel %vm230_vm1, %v550_v13, 0.0 }
 0x13e   : > { %v246_v16 = vsub.f32 %v233_v5, %v245_v14  ;;  %238 = vadd.xlane.f32.xlu1 %v237_v15 }
 0x140   : > { %v247_v17 = vmul.f32 1.442695, %v246_v16 }
 0x142   : > { %551 = vpow2.f32 %v247_v17 }
 0x148   : > { %v552_v18 = vpop.eup %551 }
 0x149   : > { %v249_v19 = vmul.f32 %v552_v18, %v550_v13 }
 0x14b   : > { %v250_v20 = vsel %vm230_vm1, %v249_v19, 0.0 }
 0x14c   : > { %v251_v21 = vrot.slane %v250_v20, 4 }
 0x14e   : > { %v252_v22 = vadd.f32 %v251_v21, %v250_v20 }
 0x150   : > { %v253_v23 = vrot.slane %v252_v22, 2 }
 0x152   : > { %v254_v24 = vadd.f32 %v253_v23, %v252_v22 }
 0x154   : > { %v255_v25 = vrot.slane %v254_v24, 1 }
 0x156   : > { %v256_v26 = vadd.f32 %v255_v25, %v254_v24 }
 0x158   : > { %553 = vrcp.f32 %v256_v26  ;;  %v307_v30 = vand.u32 2147483648, %v256_v26  ;;  %v305_v32 = vand.u32 2147483647, %v256_v26  ;;  %vm301_vm3 = vweird.f32 %v256_v26 }
 0x15a   : > { %v308_v34 = vor.u32 1.1754944e-38, %v307_v30  ;;  %vm306_vm5 = vcmp.eq.f32.partialorder %v305_v32, 8.507059e+37 }
 0x15e   : > { %v554_v27 = vpop.eup %553 }
 0x15f   : > { %v297_v28 = vmul.f32 %v554_v27, %v256_v26  ;;  %vm302_vm2 = vweird.f32 %v554_v27 }
 0x160   : > { %vm303_vm4 = vmor %vm301_vm3, %vm302_vm2 }
 0x161   : > { %v298_v29 = vsub.f32 1.0, %v297_v28 }
 0x163   : > { %v299_v31 = vmul.f32 %v554_v27, %v298_v29 }
 0x165   : > { %v300_v33 = vadd.f32 %v554_v27, %v299_v31 }
 0x167   : > { %v304_v35 = vsel %vm303_vm4, %v554_v27, %v300_v33 }
 0x168   : > { %v309_v36 = vsel %vm306_vm5, %v308_v34, %v304_v35 }
 0x169   : > { %v311_v37 = vmul.f32 %v309_v36, %v249_v19 }
 0x16b   : > { %312 = vxpose.xlu0.b32.start.end [1/1] (short) (narrow) %v311_v37, 8 }
 0x1b1   : > { %v239_v39 = vpop.xlane.xlu1 %238 }
 0x1b2   : > { %555 = vrcp.f32 %v239_v39  ;;  %v291_v45 = vand.u32 2147483648, %v239_v39  ;;  %vm285_vm7 = vweird.f32 %v239_v39  ;;  %v289_v46 = vand.u32 2147483647, %v239_v39 }
 0x1b4   : > { %v292_v48 = vor.u32 1.1754944e-38, %v291_v45  ;;  %vm290_vm9 = vcmp.eq.f32.partialorder %v289_v46, 8.507059e+37 }
 0x1b8   : > { %v556_v40 = vpop.eup %555 }
 0x1b9   : > { %v281_v41 = vmul.f32 %v556_v40, %v239_v39  ;;  %vm286_vm6 = vweird.f32 %v556_v40 }
 0x1ba   : > { %vm287_vm8 = vmor %vm285_vm7, %vm286_vm6  ;;  %v277_v50 = vpop.f32.mrf.mxu1 }
 0x1bb   : > { %v282_v42 = vsub.f32 1.0, %v281_v41 }
 0x1bd   : > { %v283_v43 = vmul.f32 %v556_v40, %v282_v42 }
 0x1bf   : > { %v284_v44 = vadd.f32 %v556_v40, %v283_v43 }
 0x1c1   : > { %v288_v47 = vsel %vm287_vm8, %v556_v40, %v284_v44 }
 0x1c2   : > { %v293_v49 = vsel %vm290_vm9, %v292_v48, %v288_v47 }
 0x1c3   : > { %v295_v51 = vmul.f32 %v293_v49, %v277_v50 }
 0x20f   : > { %v328_v38 = vpop.trf.xlu0 }
 0x210   : > { %492 = vmatmul.msk.f32.vlgmr.msra.gmra.mxu2 %vm230_vm1, %v328_v38 }
 0x293   : > { %v364_v52 = vpop.f32.mrf.mxu2 }
 0x294   : > { %v367_v53 = vadd.f32 %v364_v52, %v295_v51 }
 0x296   : > { %368 = vst.msk [vmem:[%s199_s8] sm:$0xff] %vm202_vm0, %v367_v53 }
 0x297   : > { %644 = shalt.err (!%p641_p0)
}
 0x298   : > { %501 = dma.vmem_to_hbm [thread:$0]  (%p754_p11), %s383_s14, 128, %s385_s16, %s370_s13  }
 0x299 PF: > { %s396_s23 = sand.u32 1, %s675_s9   ;;  %p886_p1 = scmp.ge.s32.totalorder %s687_s12, 2 }
 0x29a   : > { %s397_s27 = scalar_lea.sflag [#allocation4], %s396_s23 }
 0x29b   : > { %p511_p4 = pnand %p886_p1, %p758_p12 }
 0x29d   : > { %p512_p7 = pneg %p511_p4 }
 0x29f   : > { %670 = dma.done.wait (%p512_p7), %s397_s27, 128  }
 0x2a0   : > { %672 = vsyncadd (%p512_p7), %s397_s27, 4294967168  ;;  %p18_p5 = scmp.ge.s32.totalorder %s729_s15, 4   ;;  %s887_s9 = smov %s679_s10 }
 0x2a1   : > { %s888_s10 = smov %s683_s11  ;;  %s889_s11 = smov %s741_s18 }
 0x2a2   : > { %s890_s12 = smov %s729_s15  ;;  %20 = sbr.rel (!%p18_p5) target bundleno = 7 (0x7), region = 86 }
 0x2a7   :  { %403 = vsyncpa [#allocation3], 1 }
 0x2a8   :  { %405 = vsyncpa [#allocation3 + $0x1], 1 }
 0x2a9   :  { %406 = vsyncpa [#allocation6], 1 }
 0x2aa   :  { %408 = vsyncpa [#allocation6 + $0x1], 1 }
 0x2ab   :  { %409 = vsyncpa [#allocation4], 1 }
 0x2ac   :  { %411 = vsyncpa [#allocation4 + $0x1], 1 }

</bundles_post_ra>
